<compile_context>
chip_gen: v5e
topology: v5e:2x2
jax: 0.10.0
libtpu: 0.0.40
codegen_flags: <defaults>
</compile_context>

<pallas_src>
import jax
import jax.numpy as jnp
from jax.experimental import pallas as pl
from jax.experimental.pallas import tpu as pltpu

# PyTorch feature dims
IN_F, H1, H2, OUT = 784, 200, 50, 10
# lane-padded dims (multiples of 128 -> clean (8,128) tiles, full MXU columns)
H1_P, H2_P, OUT_P = 256, 128, 128


def _round_up(n, m):
    return ((n + m - 1) // m) * m


def _mlp_kernel(x_ref, w1_ref, b1_ref, w2_ref, b2_ref, w3_ref, b3_ref,
                mask_ref, o_ref):
    # x streamed as f32; cast to bf16 on the VPU (hidden under the x DMA).
    x = x_ref[...].astype(jnp.bfloat16)                          # (TB, 784)

    h1 = jnp.dot(x, w1_ref[...], preferred_element_type=jnp.float32) + b1_ref[...]
    h1 = jnp.maximum(h1, 0.0).astype(jnp.bfloat16)               # (TB, 256)

    h2 = jnp.dot(h1, w2_ref[...], preferred_element_type=jnp.float32) + b2_ref[...]
    h2 = jnp.maximum(h2, 0.0).astype(jnp.bfloat16)               # (TB, 128)

    h3 = jnp.dot(h2, w3_ref[...], preferred_element_type=jnp.float32) + b3_ref[...]
    # Padded logit lanes would be ReLU(0)=0 and corrupt the softmax normalizer;
    # the resident additive mask (-1e30 on pad lanes) pushes them out of the sum.
    h3 = jnp.maximum(h3, 0.0) + mask_ref[...]                    # (TB, 128) f32

    m = jnp.max(h3, axis=-1, keepdims=True)
    shifted = h3 - m
    lse = jnp.log(jnp.sum(jnp.exp(shifted), axis=-1, keepdims=True))
    o_ref[...] = (shifted - lse).astype(o_ref.dtype)             # (TB, 128) bf16


def init_params(key):
    """Deterministic synthetic parameters with the t_model.__init__ shapes (f32, unpadded)."""
    ks = jax.random.split(key, 6)

    def linear(kw, kb, fan_in, fan_out):
        bound = 1.0 / jnp.sqrt(fan_in)
        w = jax.random.uniform(kw, (fan_in, fan_out), jnp.float32, -bound, bound)
        b = jax.random.uniform(kb, (1, fan_out), jnp.float32, -bound, bound)
        return w, b

    w1, b1 = linear(ks[0], ks[1], IN_F, H1)
    w2, b2 = linear(ks[2], ks[3], H1, H2)
    w3, b3 = linear(ks[4], ks[5], H2, OUT)
    return (w1, b1, w2, b2, w3, b3)


def prepare_params(params):
    """Zero-pad feature dims to lane multiples; weights -> bf16, biases stay f32.

    Also builds the resident (1, OUT_P) additive logit mask.
    """
    w1, b1, w2, b2, w3, b3 = params

    def pad2(a, rows, cols):
        return jnp.pad(a, ((0, rows - a.shape[0]), (0, cols - a.shape[1])))

    w1p = pad2(w1, IN_F, H1_P).astype(jnp.bfloat16)
    b1p = pad2(b1, 1, H1_P).astype(jnp.float32)
    w2p = pad2(w2, H1_P, H2_P).astype(jnp.bfloat16)
    b2p = pad2(b2, 1, H2_P).astype(jnp.float32)
    w3p = pad2(w3, H2_P, OUT_P).astype(jnp.bfloat16)
    b3p = pad2(b3, 1, OUT_P).astype(jnp.float32)
    mask = jnp.where(jnp.arange(OUT_P)[None, :] < OUT, 0.0, -1e30).astype(jnp.float32)
    return (w1p, b1p, w2p, b2p, w3p, b3p, mask)


def t_model_forward(x, padded_params, *, tb=2048):
    """x: (B, 1, 28, 28) or (B, 784), f32. Returns (B, 10) f32 log-probs."""
    w1, b1, w2, b2, w3, b3, mask = padded_params
    B = x.shape[0]
    # x.view(B, -1); stays f32 — the bf16 cast happens inside the kernel.
    x2d = x.reshape(B, -1)

    # Batch tile: >=8 (sublane), <=tb (~6.3 MiB/tile of f32 x at TB=2048 ->
    # ~15 MiB peak with double-buffering; fits v7x's 64 MiB part easily).
    TB = min(tb, _round_up(B, 8))
    if TB >= B and B >= 16:
        # Would be a single monolithic tile: split so the "parallel" axis can
        # feed both TensorCores on v7x (and pipeline the x DMA).
        TB = _round_up(pl.cdiv(B, 2), 8)
    grid = (pl.cdiv(B, TB),)

    # Weights/biases/mask: full block, same block index every grid step -> VMEM-resident.
    def resident(shape):
        return pl.BlockSpec(shape, lambda i: (0,) * len(shape))

    flops = 2 * B * (IN_F * H1_P + H1_P * H2_P + H2_P * OUT_P)
    bytes_accessed = (
        x2d.size * 4
        + (w1.size + w2.size + w3.size) * 2
        + (b1.size + b2.size + b3.size + mask.size) * 4
        + B * OUT_P * 2
    )

    out = pl.pallas_call(
        _mlp_kernel,
        out_shape=jax.ShapeDtypeStruct((B, OUT_P), jnp.bfloat16),
        grid=grid,
        in_specs=[
            pl.BlockSpec((TB, IN_F), lambda i: (i, 0)),          # streamed f32 x tiles
            resident(w1.shape), resident(b1.shape),
            resident(w2.shape), resident(b2.shape),
            resident(w3.shape), resident(b3.shape),
            resident(mask.shape),
        ],
        out_specs=pl.BlockSpec((TB, OUT_P), lambda i: (i, 0)),   # lane-dense bf16 slab
        compiler_params=pltpu.CompilerParams(
            dimension_semantics=("parallel",),
            vmem_limit_bytes=48 << 20,
        ),
        cost_estimate=pl.CostEstimate(
            flops=flops,
            transcendentals=B * (OUT_P + 1),
            bytes_accessed=bytes_accessed,
        ),
    )(x2d, w1, b1, w2, b2, w3, b3, mask)

    # Only the first 10 lanes are real logits (pad lanes hold ~-1e30).
    # Keep this slice fused with the consumer in real pipelines.
    return out[:, :OUT].astype(jnp.float32)


def _reference(x, params):
    w1, b1, w2, b2, w3, b3 = params
    h = x.reshape(x.shape[0], -1).astype(jnp.float32)
    h = jnp.maximum(h @ w1 + b1, 0.0)
    h = jnp.maximum(h @ w2 + b2, 0.0)
    h = jnp.maximum(h @ w3 + b3, 0.0)
    return jax.nn.log_softmax(h, axis=-1)


if __name__ == "__main__":
    key = jax.random.PRNGKey(0)
    kp, kx = jax.random.split(key)
    params = init_params(kp)
    padded_params = prepare_params(params)

    # Small MNIST-shaped batch: (B, 1, 28, 28) NCHW -> flattened to 784 features.
    x = jax.random.uniform(kx, (8, 1, 28, 28), jnp.float32)

    out = t_model_forward(x, padded_params)
    out = jax.block_until_ready(out)

    ref = _reference(x, params)
    assert out.shape == (8, 10)
    assert bool(jnp.all(jnp.isfinite(out)))
    # bf16 matmul inputs + bf16 output slab -> relaxed tolerance vs the f32 reference.
    assert jnp.allclose(out, ref, atol=5e-2, rtol=5e-2), "mismatch vs reference"

    print("KERNEL_OK")
</pallas_src>

<mosaic_0001>
module attributes {stable_mosaic.version = 11 : i64} {
  func.func @_mlp_kernel(%arg0: i32, %arg1: memref<8x784xf32, #tpu.memory_space<vmem>>, %arg2: memref<784x256xbf16, #tpu.memory_space<vmem>>, %arg3: memref<1x256xf32, #tpu.memory_space<vmem>>, %arg4: memref<256x128xbf16, #tpu.memory_space<vmem>>, %arg5: memref<1x128xf32, #tpu.memory_space<vmem>>, %arg6: memref<128x128xbf16, #tpu.memory_space<vmem>>, %arg7: memref<1x128xf32, #tpu.memory_space<vmem>>, %arg8: memref<1x128xf32, #tpu.memory_space<vmem>>, %arg9: memref<8x128xbf16, #tpu.memory_space<vmem>>) attributes {dimension_semantics = [#tpu.dimension_semantics<parallel>], iteration_bounds = array<i64: 1>, scalar_prefetch = 0 : i64, scratch_operands = 0 : i64, tpu.core_type = #tpu.core_type<tc>, window_params = [{transform_indices = @transform_0, window_bounds = array<i64: 8, 784>}, {pipeline_mode = #tpu.pipeline_mode<synchronous>, transform_indices = @transform_1, window_bounds = array<i64: 784, 256>}, {pipeline_mode = #tpu.pipeline_mode<synchronous>, transform_indices = @transform_2, window_bounds = array<i64: 1, 256>}, {pipeline_mode = #tpu.pipeline_mode<synchronous>, transform_indices = @transform_3, window_bounds = array<i64: 256, 128>}, {pipeline_mode = #tpu.pipeline_mode<synchronous>, transform_indices = @transform_4, window_bounds = array<i64: 1, 128>}, {pipeline_mode = #tpu.pipeline_mode<synchronous>, transform_indices = @transform_5, window_bounds = array<i64: 128, 128>}, {pipeline_mode = #tpu.pipeline_mode<synchronous>, transform_indices = @transform_6, window_bounds = array<i64: 1, 128>}, {pipeline_mode = #tpu.pipeline_mode<synchronous>, transform_indices = @transform_7, window_bounds = array<i64: 1, 128>}, {transform_indices = @transform_8, window_bounds = array<i64: 8, 128>}]} {
    %c0 = arith.constant 0 : index
    %c0_0 = arith.constant 0 : index
    %0 = vector.load %arg1[%c0, %c0_0] : memref<8x784xf32, #tpu.memory_space<vmem>>, vector<8x784xf32>
    %1 = arith.truncf %0 : vector<8x784xf32> to vector<8x784xbf16>
    %c0_1 = arith.constant 0 : index
    %c0_2 = arith.constant 0 : index
    %2 = vector.load %arg2[%c0_1, %c0_2] : memref<784x256xbf16, #tpu.memory_space<vmem>>, vector<784x256xbf16>
    %cst = arith.constant dense<0.000000e+00> : vector<8x256xf32>
    %3 = tpu.matmul %1, %2, %cst {dimension_numbers = #tpu.dot_dimension_numbers<[1], [0], [0], [1], [0, 0, 1, 1], [], []>} : vector<8x784xbf16>, vector<784x256xbf16>, vector<8x256xf32> -> vector<8x256xf32>
    %c0_3 = arith.constant 0 : index
    %c0_4 = arith.constant 0 : index
    %4 = vector.load %arg3[%c0_3, %c0_4] : memref<1x256xf32, #tpu.memory_space<vmem>>, vector<1x256xf32>
    %5 = vector.broadcast %4 : vector<1x256xf32> to vector<8x256xf32>
    %6 = arith.addf %3, %5 : vector<8x256xf32>
    %cst_5 = arith.constant 0.000000e+00 : f32
    %7 = vector.broadcast %cst_5 : f32 to vector<8x256xf32>
    %8 = arith.maximumf %6, %7 : vector<8x256xf32>
    %9 = arith.truncf %8 : vector<8x256xf32> to vector<8x256xbf16>
    %c0_6 = arith.constant 0 : index
    %c0_7 = arith.constant 0 : index
    %10 = vector.load %arg4[%c0_6, %c0_7] : memref<256x128xbf16, #tpu.memory_space<vmem>>, vector<256x128xbf16>
    %cst_8 = arith.constant dense<0.000000e+00> : vector<8x128xf32>
    %11 = tpu.matmul %9, %10, %cst_8 {dimension_numbers = #tpu.dot_dimension_numbers<[1], [0], [0], [1], [0, 0, 1, 1], [], []>} : vector<8x256xbf16>, vector<256x128xbf16>, vector<8x128xf32> -> vector<8x128xf32>
    %c0_9 = arith.constant 0 : index
    %c0_10 = arith.constant 0 : index
    %12 = vector.load %arg5[%c0_9, %c0_10] : memref<1x128xf32, #tpu.memory_space<vmem>>, vector<1x128xf32>
    %13 = vector.broadcast %12 : vector<1x128xf32> to vector<8x128xf32>
    %14 = arith.addf %11, %13 : vector<8x128xf32>
    %cst_11 = arith.constant 0.000000e+00 : f32
    %15 = vector.broadcast %cst_11 : f32 to vector<8x128xf32>
    %16 = arith.maximumf %14, %15 : vector<8x128xf32>
    %17 = arith.truncf %16 : vector<8x128xf32> to vector<8x128xbf16>
    %c0_12 = arith.constant 0 : index
    %c0_13 = arith.constant 0 : index
    %18 = vector.load %arg6[%c0_12, %c0_13] : memref<128x128xbf16, #tpu.memory_space<vmem>>, vector<128x128xbf16>
    %cst_14 = arith.constant dense<0.000000e+00> : vector<8x128xf32>
    %19 = tpu.matmul %17, %18, %cst_14 {dimension_numbers = #tpu.dot_dimension_numbers<[1], [0], [0], [1], [0, 0, 1, 1], [], []>} : vector<8x128xbf16>, vector<128x128xbf16>, vector<8x128xf32> -> vector<8x128xf32>
    %c0_15 = arith.constant 0 : index
    %c0_16 = arith.constant 0 : index
    %20 = vector.load %arg7[%c0_15, %c0_16] : memref<1x128xf32, #tpu.memory_space<vmem>>, vector<1x128xf32>
    %21 = vector.broadcast %20 : vector<1x128xf32> to vector<8x128xf32>
    %22 = arith.addf %19, %21 : vector<8x128xf32>
    %cst_17 = arith.constant 0.000000e+00 : f32
    %23 = vector.broadcast %cst_17 : f32 to vector<8x128xf32>
    %24 = arith.maximumf %22, %23 : vector<8x128xf32>
    %c0_18 = arith.constant 0 : index
    %c0_19 = arith.constant 0 : index
    %25 = vector.load %arg8[%c0_18, %c0_19] : memref<1x128xf32, #tpu.memory_space<vmem>>, vector<1x128xf32>
    %26 = vector.broadcast %25 : vector<1x128xf32> to vector<8x128xf32>
    %27 = arith.addf %24, %26 : vector<8x128xf32>
    %cst_20 = arith.constant dense<0xFF800000> : vector<8xf32>
    %28 = vector.multi_reduction <maximumf>, %27, %cst_20 [1] : vector<8x128xf32> to vector<8xf32>
    %29 = vector.shape_cast %28 : vector<8xf32> to vector<8x1xf32>
    %30 = vector.broadcast %29 : vector<8x1xf32> to vector<8x128xf32>
    %31 = arith.subf %27, %30 : vector<8x128xf32>
    %32 = math.exp %31 : vector<8x128xf32>
    %cst_21 = arith.constant dense<0.000000e+00> : vector<8xf32>
    %33 = vector.multi_reduction <add>, %32, %cst_21 [1] : vector<8x128xf32> to vector<8xf32>
    %34 = vector.shape_cast %33 : vector<8xf32> to vector<8x1xf32>
    %35 = math.log %34 : vector<8x1xf32>
    %36 = vector.broadcast %35 : vector<8x1xf32> to vector<8x128xf32>
    %37 = arith.subf %31, %36 : vector<8x128xf32>
    %38 = arith.truncf %37 : vector<8x128xf32> to vector<8x128xbf16>
    %c0_22 = arith.constant 0 : index
    %c0_23 = arith.constant 0 : index
    %39 = vector.load %arg9[%c0_22, %c0_23] : memref<8x128xbf16, #tpu.memory_space<vmem>>, vector<8x128xbf16>
    tpu.vector_store %arg9[%c0_22, %c0_23], %38 {strides = array<i32>} : memref<8x128xbf16, #tpu.memory_space<vmem>>, vector<8x128xbf16>,
    return
  }
  func.func @transform_0(%arg0: i32) -> (i32, i32) {
    %c0_i32 = arith.constant 0 : i32
    %c0_i32_0 = arith.constant 0 : i32
    return %arg0, %c0_i32 : i32, i32
  }
  func.func @transform_1(%arg0: i32) -> (i32, i32) {
    %c0_i32 = arith.constant 0 : i32
    %c0_i32_0 = arith.constant 0 : i32
    %c0_i32_1 = arith.constant 0 : i32
    return %c0_i32, %c0_i32_0 : i32, i32
  }
  func.func @transform_2(%arg0: i32) -> (i32, i32) {
    %c0_i32 = arith.constant 0 : i32
    %c0_i32_0 = arith.constant 0 : i32
    %c0_i32_1 = arith.constant 0 : i32
    return %c0_i32, %c0_i32_0 : i32, i32
  }
  func.func @transform_3(%arg0: i32) -> (i32, i32) {
    %c0_i32 = arith.constant 0 : i32
    %c0_i32_0 = arith.constant 0 : i32
    %c0_i32_1 = arith.constant 0 : i32
    return %c0_i32, %c0_i32_0 : i32, i32
  }
  func.func @transform_4(%arg0: i32) -> (i32, i32) {
    %c0_i32 = arith.constant 0 : i32
    %c0_i32_0 = arith.constant 0 : i32
    %c0_i32_1 = arith.constant 0 : i32
    return %c0_i32, %c0_i32_0 : i32, i32
  }
  func.func @transform_5(%arg0: i32) -> (i32, i32) {
    %c0_i32 = arith.constant 0 : i32
    %c0_i32_0 = arith.constant 0 : i32
    %c0_i32_1 = arith.constant 0 : i32
    return %c0_i32, %c0_i32_0 : i32, i32
  }
  func.func @transform_6(%arg0: i32) -> (i32, i32) {
    %c0_i32 = arith.constant 0 : i32
    %c0_i32_0 = arith.constant 0 : i32
    %c0_i32_1 = arith.constant 0 : i32
    return %c0_i32, %c0_i32_0 : i32, i32
  }
  func.func @transform_7(%arg0: i32) -> (i32, i32) {
    %c0_i32 = arith.constant 0 : i32
    %c0_i32_0 = arith.constant 0 : i32
    %c0_i32_1 = arith.constant 0 : i32
    return %c0_i32, %c0_i32_0 : i32, i32
  }
  func.func @transform_8(%arg0: i32) -> (i32, i32) {
    %c0_i32 = arith.constant 0 : i32
    %c0_i32_0 = arith.constant 0 : i32
    return %arg0, %c0_i32 : i32, i32
  }
}

</mosaic_0001>

<bundles_post_ra>
// kernel: tpu_custom_call.1
= control target key start
LH: loop header
LB: loop body
LE: loop exit
PB: predicated region body
PF: predicated region fallthrough
CT: control target
= control target key end

     0   :  { %13 = vsyncpa [#allocation3], 0  ;;  %s2074_s0 = inlined_call_operand.hbm [shape: f32[8,784], index: 0, kind: input, shape index: {}]   ;;  %s2075_s1 = inlined_call_operand.hbm [shape: bf16[784,256], index: 1, kind: input, shape index: {}]   ;;  %s2076_s2 = inlined_call_operand.hbm [shape: f32[1,256], index: 2, kind: input, shape index: {}]   ;;  %s2077_s3 = inlined_call_operand.hbm [shape: bf16[256,128], index: 3, kind: input, shape index: {}]   ;;  %s2078_s4 = inlined_call_operand.vmem [shape: f32[1,128], index: 4, kind: input, shape index: {}]   ;;  %s2079_s5 = inlined_call_operand.hbm [shape: bf16[128,128], index: 5, kind: input, shape index: {}]   ;;  %s2080_s6 = inlined_call_operand.vmem [shape: f32[1,128], index: 6, kind: input, shape index: {}]   ;;  %s2081_s7 = inlined_call_operand.vmem [shape: f32[1,128], index: 7, kind: input, shape index: {}]   ;;  %s2082_s8 = inlined_call_operand.hbm [shape: bf16[8,128], index: 8, kind: output, shape index: {}]  }
   0x1   :  { %14 = vsyncpa [#allocation6], 0 }
   0x2   :  { %15 = vsyncpa [#allocation9], 0  ;;  %s32_s29 = sshll.u32 %s2075_s1, 4  ;;  %s33_s29 = int_to_ptr.hbm [resolvable:$true] %s32_s29 }
   0x3   :  { %16 = vsyncpa [#allocation4], 0  ;;  %s1962_s30 = smov [#allocation5]   ;;  %s56_s12 = sshll.u32 %s2077_s3, 4  ;;  %s57_s12 = int_to_ptr.hbm [resolvable:$true] %s56_s12 }
   0x4   :  { %s34_s9 = sshll.u32 %s1962_s30, 4  ;;  %s1963_s13 = smov 128   ;;  %s35_s9 = int_to_ptr.vmem [resolvable:$true] %s34_s9 }
   0x5   :  { %s1964_s14 = smov 8   ;;  %s1965_s15 = smov [#allocation8]  }
   0x6   :  { %40 = dma.hbm_to_vmem [thread:$0]  %s33_s29, 12544, %s35_s9, [#allocation6], %s1963_s13, %s1963_s13, %s1964_s14  }
   0x7   :  { %s58_s16 = sshll.u32 %s1965_s15, 4  ;;  %s1966_s17 = smov 64   ;;  %s59_s16 = int_to_ptr.vmem [resolvable:$true] %s58_s16 }
   0x8   :  { %s1967_s18 = smov 4   ;;  %s22_s20 = sshll.u32 %s2074_s0, 4  ;;  %s23_s20 = int_to_ptr.hbm [resolvable:$true] %s22_s20 }
   0x9   :  { %64 = dma.hbm_to_vmem [thread:$0]  %s57_s12, 2048, %s59_s16, [#allocation9], %s1966_s17, %s1966_s17, %s1967_s18  }
   0xa   :  { %s1968_s21 = smov [#allocation2]   ;;  %s46_s24 = sshll.u32 %s2076_s2, 4  ;;  %s47_s24 = int_to_ptr.hbm [resolvable:$true] %s46_s24 }
   0xb   :  { %s24_s22 = sshll.u32 %s1968_s21, 4  ;;  %s1969_s25 = smov [#allocation7]   ;;  %s25_s22 = int_to_ptr.vmem [resolvable:$true] %s24_s22 }
   0xc   :  { %27 = dma.hbm_to_vmem [thread:$0]  %s23_s20, 896, %s25_s22, [#allocation3]  }
   0xd   :  { %s48_s26 = sshll.u32 %s1969_s25, 4  ;;  %s71_s29 = sshll.u32 %s2079_s5, 4  ;;  %s49_s26 = int_to_ptr.vmem [resolvable:$true] %s48_s26  ;;  %s72_s29 = int_to_ptr.hbm [resolvable:$true] %s71_s29 }
   0xe   :  { %51 = dma.hbm_to_vmem [thread:$0]  %s47_s24, 32, %s49_s26, [#allocation6]  }
   0xf   :  { %s1970_s0 = smov [#allocation10]  }
  0x10   :  { %s73_s30 = sshll.u32 %s1970_s0, 4  ;;  %s74_s30 = int_to_ptr.vmem [resolvable:$true] %s73_s30 }
  0x11   :  { %79 = dma.hbm_to_vmem [thread:$0]  %s72_s29, 1024, %s74_s30, [#allocation9], %s1966_s17, %s1966_s17, %s1967_s18  }
  0x12   :  { %1954 = dma.done.wait [#allocation3], 896  }
  0x13   :  { %1955 = vsyncadd [#allocation3], 4294966400 }
  0x14   :  { %1956 = dma.done.wait [#allocation6], 12576  }
  0x15   :  { %1957 = vsyncadd [#allocation6], 4294954720 }
  0x16   :  { %1958 = dma.done.wait [#allocation9], 3072  }
  0x17   :  { %1959 = vsyncadd [#allocation9], 4294964224  ;;  %v1239_v0 = vld [vmem:[#allocation5 + $0x70] sm:$0xf]  ;;  %v1686_v1 = vld [vmem:[#allocation5 + $0x74] sm:$0xf0] }
  0x18   :  { %v1367_v2 = vld [vmem:[#allocation5 + $0x170] sm:$0xf]  ;;  %v1240_v3 = vor.u32 %v1686_v1, %v1239_v0  ;;  %v1718_v4 = vld [vmem:[#allocation5 + $0x174] sm:$0xf0]  ;;  %v1231_v11 = vld [vmem:[#allocation5 + $0x60] sm:$0xf] }
  0x19   :  { %v1431_v5 = vld [vmem:[#allocation5 + $0x1f0] sm:$0xf]  ;;  %v1734_v6 = vld [vmem:[#allocation5 + $0x1f4] sm:$0xf0]  ;;  %v1368_v7 = vor.u32 %v1718_v4, %v1367_v2  ;;  %v1684_v13 = vld [vmem:[#allocation5 + $0x64] sm:$0xf0] }
  0x1a   :  { %v1432_v8 = vor.u32 %v1734_v6, %v1431_v5  ;;  %v1303_v9 = vld [vmem:[#allocation5 + $0xf0] sm:$0xf]  ;;  %v1702_v10 = vld [vmem:[#allocation5 + $0xf4] sm:$0xf0]  ;;  %717 = vmatpush.bf16.msra.mxu0 %v1240_v3  ;;  %v1359_v14 = vld [vmem:[#allocation5 + $0x160] sm:$0xf]  ;;  %v1232_v16 = vor.u32 %v1684_v13, %v1231_v11 }
  0x1b   :  { %v1304_v12 = vor.u32 %v1702_v10, %v1303_v9  ;;  %v1716_v15 = vld [vmem:[#allocation5 + $0x164] sm:$0xf0]  ;;  %743 = vmatpush.bf16.msra.mxu2 %v1368_v7  ;;  %v1423_v18 = vld [vmem:[#allocation5 + $0x1e0] sm:$0xf]  ;;  %v1223_v23 = vld [vmem:[#allocation5 + $0x50] sm:$0xf] }
  0x1c   :  { %756 = vmatpush.bf16.msra.mxu3 %v1432_v8  ;;  %v1360_v17 = vor.u32 %v1716_v15, %v1359_v14  ;;  %v1732_v19 = vld [vmem:[#allocation5 + $0x1e4] sm:$0xf0]  ;;  %v1295_v20 = vld [vmem:[#allocation5 + $0xe0] sm:$0xf]  ;;  %v1682_v24 = vld [vmem:[#allocation5 + $0x54] sm:$0xf0] }
  0x1d   :  { %730 = vmatpush.bf16.msra.mxu1 %v1304_v12  ;;  %v1424_v21 = vor.u32 %v1732_v19, %v1423_v18  ;;  %v1700_v22 = vld [vmem:[#allocation5 + $0xe4] sm:$0xf0]  ;;  %v1351_v26 = vld [vmem:[#allocation5 + $0x150] sm:$0xf]  ;;  %v1714_v27 = vld [vmem:[#allocation5 + $0x154] sm:$0xf0]  ;;  %v1224_v29 = vor.u32 %v1682_v24, %v1223_v23 }
  0x1e   :  { %v1296_v25 = vor.u32 %v1700_v22, %v1295_v20  ;;  %v1415_v28 = vld [vmem:[#allocation5 + $0x1d0] sm:$0xf]  ;;  %718 = vmatpush.bf16.msra.mxu0 %v1232_v16  ;;  %v1730_v30 = vld [vmem:[#allocation5 + $0x1d4] sm:$0xf0]  ;;  %v1352_v33 = vor.u32 %v1714_v27, %v1351_v26  ;;  %v1215_v35 = vld [vmem:[#allocation5 + $0x40] sm:$0xf] }
  0x1f   :  { %v1287_v31 = vld [vmem:[#allocation5 + $0xd0] sm:$0xf]  ;;  %v1698_v32 = vld [vmem:[#allocation5 + $0xd4] sm:$0xf0]  ;;  %744 = vmatpush.bf16.msra.mxu2 %v1360_v17  ;;  %v1416_v34 = vor.u32 %v1730_v30, %v1415_v28  ;;  %v1680_v36 = vld [vmem:[#allocation5 + $0x44] sm:$0xf0] }
  0x20   :  { %757 = vmatpush.bf16.msra.mxu3 %v1424_v21  ;;  %v1343_v37 = vld [vmem:[#allocation5 + $0x140] sm:$0xf]  ;;  %v1288_v38 = vor.u32 %v1698_v32, %v1287_v31  ;;  %v1712_v39 = vld [vmem:[#allocation5 + $0x144] sm:$0xf0]  ;;  %v1216_v44 = vor.u32 %v1680_v36, %v1215_v35  ;;  %v1207_v47 = vld [vmem:[#allocation5 + $0x30] sm:$0xf] }
  0x21   :  { %731 = vmatpush.bf16.msra.mxu1 %v1296_v25  ;;  %v1407_v40 = vld [vmem:[#allocation5 + $0x1c0] sm:$0xf]  ;;  %v1728_v41 = vld [vmem:[#allocation5 + $0x1c4] sm:$0xf0]  ;;  %v1344_v45 = vor.u32 %v1712_v39, %v1343_v37  ;;  %v1678_v48 = vld [vmem:[#allocation5 + $0x34] sm:$0xf0] }
  0x22   :  { %v1279_v42 = vld [vmem:[#allocation5 + $0xc0] sm:$0xf]  ;;  %v1696_v43 = vld [vmem:[#allocation5 + $0xc4] sm:$0xf0]  ;;  %719 = vmatpush.bf16.msra.mxu0 %v1224_v29  ;;  %v1408_v46 = vor.u32 %v1728_v41, %v1407_v40  ;;  %v1335_v49 = vld [vmem:[#allocation5 + $0x130] sm:$0xf]  ;;  %v1208_v56 = vor.u32 %v1678_v48, %v1207_v47 }
  0x23   :  { %745 = vmatpush.bf16.msra.mxu2 %v1352_v33  ;;  %v1280_v50 = vor.u32 %v1696_v43, %v1279_v42  ;;  %v1710_v51 = vld [vmem:[#allocation5 + $0x134] sm:$0xf0]  ;;  %v1399_v52 = vld [vmem:[#allocation5 + $0x1b0] sm:$0xf]  ;;  %v1199_v59 = vld [vmem:[#allocation5 + $0x20] sm:$0xf] }
  0x24   :  { %758 = vmatpush.bf16.msra.mxu3 %v1416_v34  ;;  %v1726_v53 = vld [vmem:[#allocation5 + $0x1b4] sm:$0xf0]  ;;  %v1271_v54 = vld [vmem:[#allocation5 + $0xb0] sm:$0xf]  ;;  %v1336_v57 = vor.u32 %v1710_v51, %v1335_v49  ;;  %v1676_v60 = vld [vmem:[#allocation5 + $0x24] sm:$0xf0] }
  0x25   :  { %732 = vmatpush.bf16.msra.mxu1 %v1288_v38  ;;  %v1694_v55 = vld [vmem:[#allocation5 + $0xb4] sm:$0xf0]  ;;  %v1400_v58 = vor.u32 %v1726_v53, %v1399_v52  ;;  %v1327_v61 = vld [vmem:[#allocation5 + $0x120] sm:$0xf]  ;;  %v1708_v63 = vld [vmem:[#allocation5 + $0x124] sm:$0xf0]  ;;  %v1200_v4 = vor.u32 %v1676_v60, %v1199_v59 }
  0x26   :  { %720 = vmatpush.bf16.msra.mxu0 %v1216_v44  ;;  %v1272_v62 = vor.u32 %v1694_v55, %v1271_v54  ;;  %v1391_v0 = vld [vmem:[#allocation5 + $0x1a0] sm:$0xf]  ;;  %v1724_v1 = vld [vmem:[#allocation5 + $0x1a4] sm:$0xf0]  ;;  %v1328_v5 = vor.u32 %v1708_v63, %v1327_v61  ;;  %v1191_v7 = vld [vmem:[#allocation5 + $0x10] sm:$0xf] }
  0x27   :  { %746 = vmatpush.bf16.msra.mxu2 %v1344_v45  ;;  %v1263_v2 = vld [vmem:[#allocation5 + $0xa0] sm:$0xf]  ;;  %v1692_v3 = vld [vmem:[#allocation5 + $0xa4] sm:$0xf0]  ;;  %v1392_v6 = vor.u32 %v1724_v1, %v1391_v0  ;;  %v1674_v8 = vld [vmem:[#allocation5 + $0x14] sm:$0xf0] }
  0x28   :  { %759 = vmatpush.bf16.msra.mxu3 %v1408_v46  ;;  %v1319_v9 = vld [vmem:[#allocation5 + $0x110] sm:$0xf]  ;;  %v1264_v10 = vor.u32 %v1692_v3, %v1263_v2  ;;  %v1706_v11 = vld [vmem:[#allocation5 + $0x114] sm:$0xf0]  ;;  %v1192_v16 = vor.u32 %v1674_v8, %v1191_v7  ;;  %v1183_v17 = vld [vmem:[#allocation5] sm:$0xf] }
  0x29   :  { %733 = vmatpush.bf16.msra.mxu1 %v1280_v50  ;;  %v1383_v12 = vld [vmem:[#allocation5 + $0x190] sm:$0xf]  ;;  %v1722_v13 = vld [vmem:[#allocation5 + $0x194] sm:$0xf0]  ;;  %v1672_v18 = vld [vmem:[#allocation5 + $0x4] sm:$0xf0]  ;;  %v1320_v20 = vor.u32 %v1706_v11, %v1319_v9 }
  0x2a   :  { %721 = vmatpush.bf16.msra.mxu0 %v1208_v56  ;;  %v1255_v14 = vld [vmem:[#allocation5 + $0x90] sm:$0xf]  ;;  %v1690_v15 = vld [vmem:[#allocation5 + $0x94] sm:$0xf0]  ;;  %v1311_v19 = vld [vmem:[#allocation5 + $0x100] sm:$0xf]  ;;  %v1384_v21 = vor.u32 %v1722_v13, %v1383_v12  ;;  %v1184_v32 = vor.u32 %v1672_v18, %v1183_v17 }
  0x2b   :  { %747 = vmatpush.bf16.msra.mxu2 %v1336_v57  ;;  %v1704_v22 = vld [vmem:[#allocation5 + $0x104] sm:$0xf0]  ;;  %v1375_v23 = vld [vmem:[#allocation5 + $0x180] sm:$0xf]  ;;  %v1256_v25 = vor.u32 %v1690_v15, %v1255_v14  ;;  %v1495_v26 = vld [vmem:[#allocation5 + $0x270] sm:$0xf] }
  0x2c   :  { %760 = vmatpush.bf16.msra.mxu3 %v1400_v58  ;;  %v1720_v24 = vld [vmem:[#allocation5 + $0x184] sm:$0xf0]  ;;  %v1750_v27 = vld [vmem:[#allocation5 + $0x274] sm:$0xf0]  ;;  %v1685_v28 = vld [vmem:[#allocation5 + $0x74] sm:$0xf]  ;;  %v1312_v36 = vor.u32 %v1704_v22, %v1311_v19 }
  0x2d   :  { %734 = vmatpush.bf16.msra.mxu1 %v1272_v62  ;;  %v1241_v29 = vld [vmem:[#allocation5 + $0x78] sm:$0xf0]  ;;  %v1247_v30 = vld [vmem:[#allocation5 + $0x80] sm:$0xf]  ;;  %v1688_v31 = vld [vmem:[#allocation5 + $0x84] sm:$0xf0]  ;;  %v1376_v37 = vor.u32 %v1720_v24, %v1375_v23  ;;  %v1496_v41 = vor.u32 %v1750_v27, %v1495_v26 }
  0x2e   :  { %722 = vmatpush.bf16.msra.mxu0 %v1200_v4  ;;  %v107_v33 = vld [vmem:[#allocation2 + $0x10] sm:$0xff]  ;;  %v1567_v34 = vld [vmem:[#allocation5 + $0x300] sm:$0xf]  ;;  %v1768_v35 = vld [vmem:[#allocation5 + $0x304] sm:$0xf0]  ;;  %v1244_v42 = vor.u32 %v1685_v28, %v1241_v29  ;;  %v1248_v46 = vor.u32 %v1688_v31, %v1247_v30  ;;  %vm713_vm0 = vcmask 130048  }
  0x2f   :  { %748 = vmatpush.bf16.msra.mxu2 %v1328_v5  ;;  %v1559_v38 = vld [vmem:[#allocation5 + $0x2f0] sm:$0xf]  ;;  %v1766_v39 = vld [vmem:[#allocation5 + $0x2f4] sm:$0xf0]  ;;  %v1701_v40 = vld [vmem:[#allocation5 + $0xf4] sm:$0xf]  ;;  %v1568_v47 = vor.u32 %v1768_v35, %v1567_v34  ;;  %v2032_v51 = vpack.c.bf16 %v107_v33, %v107_v33 }
  0x30   :  { %761 = vmatpush.bf16.msra.mxu3 %v1392_v6  ;;  %v1305_v43 = vld [vmem:[#allocation5 + $0xf8] sm:$0xf0]  ;;  %v1487_v44 = vld [vmem:[#allocation5 + $0x260] sm:$0xf]  ;;  %v105_v45 = vld [vmem:[#allocation2] sm:$0xff]  ;;  %v1560_v52 = vor.u32 %v1766_v39, %v1559_v38 }
  0x31   :  { %735 = vmatpush.bf16.msra.mxu1 %v1264_v10  ;;  %v1748_v48 = vld [vmem:[#allocation5 + $0x264] sm:$0xf0]  ;;  %v1683_v49 = vld [vmem:[#allocation5 + $0x64] sm:$0xf]  ;;  %v1233_v50 = vld [vmem:[#allocation5 + $0x68] sm:$0xf0]  ;;  %v1308_v55 = vor.u32 %v1701_v40, %v1305_v43  ;;  %v2034_v56 = vpack.c.bf16 %v105_v45, %v105_v45 }
  0x32   :  { %723 = vmatpush.bf16.msra.mxu0 %v1192_v16  ;;  %v108_v53 = vld [vmem:[#allocation2 + $0x18] sm:$0xff]  ;;  %v106_v54 = vld [vmem:[#allocation2 + $0x8] sm:$0xff]  ;;  %v1764_v58 = vld [vmem:[#allocation5 + $0x2e4] sm:$0xf0]  ;;  %v1488_v59 = vor.u32 %v1748_v48, %v1487_v44  ;;  %v1236_v60 = vor.u32 %v1683_v49, %v1233_v50 }
  0x33   :  { %749 = vmatpush.bf16.msra.mxu2 %v1320_v20  ;;  %v1551_v57 = vld [vmem:[#allocation5 + $0x2e0] sm:$0xf]  ;;  %v1699_v61 = vld [vmem:[#allocation5 + $0xe4] sm:$0xf]  ;;  %v1297_v62 = vld [vmem:[#allocation5 + $0xe8] sm:$0xf0]  ;;  %v2036_v0 = vpack.c.bf16 %v108_v53, %v108_v53  ;;  %v2038_v1 = vpack.c.bf16 %v106_v54, %v106_v54 }
  0x34   :  { %762 = vmatpush.bf16.msra.mxu3 %v1384_v21  ;;  %v1479_v63 = vld [vmem:[#allocation5 + $0x250] sm:$0xf]  ;;  %v1746_v2 = vld [vmem:[#allocation5 + $0x254] sm:$0xf0]  ;;  %v1681_v3 = vld [vmem:[#allocation5 + $0x54] sm:$0xf]  ;;  %v1552_v5 = vor.u32 %v1764_v58, %v1551_v57  ;;  %v1300_v6 = vor.u32 %v1699_v61, %v1297_v62 }
  0x35   :  { %736 = vmatpush.bf16.msra.mxu1 %v1256_v25  ;;  %v1225_v4 = vld [vmem:[#allocation5 + $0x58] sm:$0xf0]  ;;  %v1543_v7 = vld [vmem:[#allocation5 + $0x2d0] sm:$0xf]  ;;  %v1762_v8 = vld [vmem:[#allocation5 + $0x2d4] sm:$0xf0]  ;;  %v1480_v9 = vor.u32 %v1746_v2, %v1479_v63 }
  0x36   :  { %724 = vmatpush.bf16.msra.mxu0 %v1184_v32  ;;  %v1228_v10 = vor.u32 %v1681_v3, %v1225_v4  ;;  %v1697_v11 = vld [vmem:[#allocation5 + $0xd4] sm:$0xf]  ;;  %v1289_v12 = vld [vmem:[#allocation5 + $0xd8] sm:$0xf0]  ;;  %v1471_v13 = vld [vmem:[#allocation5 + $0x240] sm:$0xf]  ;;  %v1544_v17 = vor.u32 %v1762_v8, %v1543_v7 }
  0x37   :  { %750 = vmatpush.bf16.msra.mxu2 %v1312_v36  ;;  %v1744_v14 = vld [vmem:[#allocation5 + $0x244] sm:$0xf0]  ;;  %v1679_v15 = vld [vmem:[#allocation5 + $0x44] sm:$0xf]  ;;  %v1217_v16 = vld [vmem:[#allocation5 + $0x48] sm:$0xf0]  ;;  %v1292_v18 = vor.u32 %v1697_v11, %v1289_v12 }
  0x38   :  { %763 = vmatpush.bf16.msra.mxu3 %v1376_v37  ;;  %v1535_v19 = vld [vmem:[#allocation5 + $0x2c0] sm:$0xf]  ;;  %v1760_v20 = vld [vmem:[#allocation5 + $0x2c4] sm:$0xf0]  ;;  %v1472_v21 = vor.u32 %v1744_v14, %v1471_v13  ;;  %v1220_v22 = vor.u32 %v1679_v15, %v1217_v16  ;;  %v1695_v23 = vld [vmem:[#allocation5 + $0xc4] sm:$0xf] }
  0x39   :  { %737 = vmatpush.bf16.msra.mxu1 %v1248_v46  ;;  %725 = vmatmul.bf16.vlgmr.msra.gmra.mxu0 %v2034_v56  ;;  %v1281_v24 = vld [vmem:[#allocation5 + $0xc8] sm:$0xf0]  ;;  %v1463_v25 = vld [vmem:[#allocation5 + $0x230] sm:$0xf]  ;;  %v1742_v26 = vld [vmem:[#allocation5 + $0x234] sm:$0xf0]  ;;  %v1536_v29 = vor.u32 %v1760_v20, %v1535_v19 }
  0x3a   :  { %769 = vmatpush.bf16.msrb.mxu0 %v1496_v41  ;;  %751 = vmatmul.bf16.vlgmr.msra.gmra.mxu2 %v2032_v51  ;;  %v1677_v27 = vld [vmem:[#allocation5 + $0x34] sm:$0xf]  ;;  %v1209_v28 = vld [vmem:[#allocation5 + $0x38] sm:$0xf0]  ;;  %v1284_v30 = vor.u32 %v1695_v23, %v1281_v24  ;;  %v1527_v31 = vld [vmem:[#allocation5 + $0x2b0] sm:$0xf]  ;;  %v1464_v34 = vor.u32 %v1742_v26, %v1463_v25 }
  0x3b   :  { %802 = vmatpush.bf16.msrb.mxu2 %v1568_v47  ;;  %764 = vmatmul.bf16.vlgmr.msra.gmra.mxu3 %v2036_v0  ;;  %v1758_v32 = vld [vmem:[#allocation5 + $0x2b4] sm:$0xf0]  ;;  %v1212_v35 = vor.u32 %v1677_v27, %v1209_v28  ;;  %v1693_v36 = vld [vmem:[#allocation5 + $0xb4] sm:$0xf]  ;;  %v1273_v37 = vld [vmem:[#allocation5 + $0xb8] sm:$0xf0] }
  0x3c   :  { %808 = vmatpush.bf16.msrb.mxu3 %v1244_v42  ;;  %738 = vmatmul.bf16.vlgmr.msra.gmra.mxu1 %v2038_v1  ;;  %v111_v33 = vld [vmem:[#allocation2 + $0x30] sm:$0xff]  ;;  %v1455_v38 = vld [vmem:[#allocation5 + $0x220] sm:$0xf]  ;;  %v1740_v39 = vld [vmem:[#allocation5 + $0x224] sm:$0xf0]  ;;  %v1528_v42 = vor.u32 %v1758_v32, %v1527_v31  ;;  %v1276_v44 = vor.u32 %v1693_v36, %v1273_v37 }
  0x3d   :  { %782 = vmatpush.bf16.msrb.mxu1 %v1560_v52  ;;  %v1675_v40 = vld [vmem:[#allocation5 + $0x24] sm:$0xf]  ;;  %v1201_v41 = vld [vmem:[#allocation5 + $0x28] sm:$0xf0]  ;;  %v2044_v43 = vpack.c.bf16 %v111_v33, %v111_v33  ;;  %v1519_v45 = vld [vmem:[#allocation5 + $0x2a0] sm:$0xf]  ;;  %v1456_v47 = vor.u32 %v1740_v39, %v1455_v38 }
  0x3e   :  { %770 = vmatpush.bf16.msrb.mxu0 %v1488_v59  ;;  %v1756_v46 = vld [vmem:[#allocation5 + $0x2a4] sm:$0xf0]  ;;  %v1204_v48 = vor.u32 %v1675_v40, %v1201_v41  ;;  %v1691_v49 = vld [vmem:[#allocation5 + $0xa4] sm:$0xf]  ;;  %v1265_v50 = vld [vmem:[#allocation5 + $0xa8] sm:$0xf0] }
  0x3f   :  { %821 = vmatpush.bf16.msra.mxu2 %v1308_v55  ;;  %v1447_v52 = vld [vmem:[#allocation5 + $0x210] sm:$0xf]  ;;  %v1738_v53 = vld [vmem:[#allocation5 + $0x214] sm:$0xf0]  ;;  %v1673_v54 = vld [vmem:[#allocation5 + $0x14] sm:$0xf]  ;;  %v1520_v57 = vor.u32 %v1756_v46, %v1519_v45  ;;  %v1268_v58 = vor.u32 %v1691_v49, %v1265_v50 }
  0x40   :  { %809 = vmatpush.bf16.msrb.mxu3 %v1236_v60  ;;  %v1193_v55 = vld [vmem:[#allocation5 + $0x18] sm:$0xf0]  ;;  %v1511_v59 = vld [vmem:[#allocation5 + $0x290] sm:$0xf]  ;;  %v1754_v60 = vld [vmem:[#allocation5 + $0x294] sm:$0xf0]  ;;  %v1448_v62 = vor.u32 %v1738_v53, %v1447_v52 }
  0x41   :  { %783 = vmatpush.bf16.msrb.mxu1 %v1552_v5  ;;  %v1689_v61 = vld [vmem:[#allocation5 + $0x94] sm:$0xf]  ;;  %v1196_v63 = vor.u32 %v1673_v54, %v1193_v55  ;;  %v1257_v2 = vld [vmem:[#allocation5 + $0x98] sm:$0xf0]  ;;  %v1439_v3 = vld [vmem:[#allocation5 + $0x200] sm:$0xf]  ;;  %v1512_v8 = vor.u32 %v1754_v60, %v1511_v59 }
  0x42   :  { %771 = vmatpush.bf16.msrb.mxu0 %v1480_v9  ;;  %v1736_v4 = vld [vmem:[#allocation5 + $0x204] sm:$0xf0]  ;;  %v1671_v5 = vld [vmem:[#allocation5 + $0x4] sm:$0xf]  ;;  %v1717_v7 = vld [vmem:[#allocation5 + $0x174] sm:$0xf]  ;;  %v1260_v12 = vor.u32 %v1689_v61, %v1257_v2 }
  0x43   :  { %822 = vmatpush.bf16.msra.mxu2 %v1300_v6  ;;  %v1185_v6 = vld [vmem:[#allocation5 + $0x8] sm:$0xf0]  ;;  %v1369_v9 = vld [vmem:[#allocation5 + $0x178] sm:$0xf0]  ;;  %v1503_v13 = vld [vmem:[#allocation5 + $0x280] sm:$0xf]  ;;  %v1440_v16 = vor.u32 %v1736_v4, %v1439_v3 }
  0x44   :  { %810 = vmatpush.bf16.msrb.mxu3 %v1228_v10  ;;  %v1749_v10 = vld [vmem:[#allocation5 + $0x274] sm:$0xf]  ;;  %v1497_v11 = vld [vmem:[#allocation5 + $0x278] sm:$0xf0]  ;;  %v1752_v14 = vld [vmem:[#allocation5 + $0x284] sm:$0xf0] }
  0x45   :  { %784 = vmatpush.bf16.msrb.mxu1 %v1544_v17  ;;  %v109_v15 = vld [vmem:[#allocation2 + $0x20] sm:$0xff]  ;;  %v1188_v17 = vor.u32 %v1671_v5, %v1185_v6  ;;  %v1733_v20 = vld [vmem:[#allocation5 + $0x1f4] sm:$0xf]  ;;  %v1433_v23 = vld [vmem:[#allocation5 + $0x1f8] sm:$0xf0]  ;;  %v1504_v26 = vor.u32 %v1752_v14, %v1503_v13 }
  0x46   :  { %772 = vmatpush.bf16.msrb.mxu0 %v1472_v21  ;;  %v1249_v19 = vld [vmem:[#allocation5 + $0x88] sm:$0xf0]  ;;  %v1372_v21 = vor.u32 %v1717_v7, %v1369_v9  ;;  %v1765_v24 = vld [vmem:[#allocation5 + $0x2f4] sm:$0xf]  ;;  %v1561_v25 = vld [vmem:[#allocation5 + $0x2f8] sm:$0xf0] }
  0x47   :  { %823 = vmatpush.bf16.msra.mxu2 %v1292_v18  ;;  %v1687_v18 = vld [vmem:[#allocation5 + $0x84] sm:$0xf]  ;;  %v110_v27 = vld [vmem:[#allocation2 + $0x28] sm:$0xff]  ;;  %v1489_v33 = vld [vmem:[#allocation5 + $0x268] sm:$0xf0] }
  0x48   :  { %811 = vmatpush.bf16.msrb.mxu3 %v1220_v22  ;;  %v1500_v22 = vor.u32 %v1749_v10, %v1497_v11  ;;  %v1715_v28 = vld [vmem:[#allocation5 + $0x164] sm:$0xf]  ;;  %v1252_v31 = vor.u32 %v1687_v18, %v1249_v19  ;;  %v2050_v37 = vpack.c.bf16 %v110_v27, %v110_v27  ;;  %v1425_v39 = vld [vmem:[#allocation5 + $0x1e8] sm:$0xf0]  ;;  %v1353_v45 = vld [vmem:[#allocation5 + $0x158] sm:$0xf0] }
  0x49   :  { %785 = vmatpush.bf16.msrb.mxu1 %v1536_v29  ;;  %v1361_v29 = vld [vmem:[#allocation5 + $0x168] sm:$0xf0]  ;;  %v1747_v32 = vld [vmem:[#allocation5 + $0x264] sm:$0xf]  ;;  %v1745_v46 = vld [vmem:[#allocation5 + $0x254] sm:$0xf] }
  0x4a   :  { %773 = vmatpush.bf16.msrb.mxu0 %v1464_v34  ;;  %1573 = vmatmul.msk.bf16.vlgmr.msrb.gmra.mxu2 %vm713_vm0, %v2044_v43  ;;  %v1436_v34 = vor.u32 %v1733_v20, %v1433_v23  ;;  %v1731_v36 = vld [vmem:[#allocation5 + $0x1e4] sm:$0xf]  ;;  %v1364_v38 = vor.u32 %v1715_v28, %v1361_v29  ;;  %v1553_v41 = vld [vmem:[#allocation5 + $0x2e8] sm:$0xf0]  ;;  %v1729_v50 = vld [vmem:[#allocation5 + $0x1d4] sm:$0xf] }
  0x4b   :  { %824 = vmatpush.bf16.msra.mxu2 %v1284_v30  ;;  %v2048_v30 = vpack.c.bf16 %v109_v15, %v109_v15  ;;  %v1763_v40 = vld [vmem:[#allocation5 + $0x2e4] sm:$0xf]  ;;  %v1417_v52 = vld [vmem:[#allocation5 + $0x1d8] sm:$0xf0]  ;;  %v1761_v54 = vld [vmem:[#allocation5 + $0x2d4] sm:$0xf] }
  0x4c   :  { %812 = vmatpush.bf16.msrb.mxu3 %v1212_v35  ;;  %v1564_v35 = vor.u32 %v1765_v24, %v1561_v25  ;;  %v1556_v49 = vor.u32 %v1763_v40, %v1553_v41  ;;  %v1545_v55 = vld [vmem:[#allocation5 + $0x2d8] sm:$0xf0]  ;;  %v1345_v59 = vld [vmem:[#allocation5 + $0x148] sm:$0xf0]  ;;  %v1743_v60 = vld [vmem:[#allocation5 + $0x244] sm:$0xf] }
  0x4d   :  { %786 = vmatpush.bf16.msrb.mxu1 %v1528_v42  ;;  %v1492_v42 = vor.u32 %v1747_v32, %v1489_v33  ;;  %v1473_v61 = vld [vmem:[#allocation5 + $0x248] sm:$0xf0]  ;;  %v1727_v2 = vld [vmem:[#allocation5 + $0x1c4] sm:$0xf]  ;;  %v1337_v9 = vld [vmem:[#allocation5 + $0x138] sm:$0xf0] }
  0x4e   :  { %774 = vmatpush.bf16.msrb.mxu0 %v1456_v47  ;;  %v1481_v47 = vld [vmem:[#allocation5 + $0x258] sm:$0xf0]  ;;  %v1409_v4 = vld [vmem:[#allocation5 + $0x1c8] sm:$0xf0]  ;;  %v1759_v5 = vld [vmem:[#allocation5 + $0x2c4] sm:$0xf]  ;;  %v1476_v7 = vor.u32 %v1743_v60, %v1473_v61 }
  0x4f   :  { %825 = vmatpush.bf16.msra.mxu2 %v1276_v44  ;;  %v1713_v44 = vld [vmem:[#allocation5 + $0x154] sm:$0xf]  ;;  %v1537_v6 = vld [vmem:[#allocation5 + $0x2c8] sm:$0xf0]  ;;  %v1465_v10 = vld [vmem:[#allocation5 + $0x238] sm:$0xf0]  ;;  %v1412_v11 = vor.u32 %v1727_v2, %v1409_v4 }
  0x50   :  { %813 = vmatpush.bf16.msrb.mxu3 %v1204_v48  ;;  %v1428_v48 = vor.u32 %v1731_v36, %v1425_v39  ;;  %v1356_v53 = vor.u32 %v1713_v44, %v1353_v45  ;;  %v1401_v14 = vld [vmem:[#allocation5 + $0x1b8] sm:$0xf0]  ;;  %v1757_v15 = vld [vmem:[#allocation5 + $0x2b4] sm:$0xf]  ;;  %v1707_v18 = vld [vmem:[#allocation5 + $0x124] sm:$0xf] }
  0x51   :  { %787 = vmatpush.bf16.msrb.mxu1 %v1520_v57  ;;  %v1711_v57 = vld [vmem:[#allocation5 + $0x144] sm:$0xf]  ;;  %v1329_v19 = vld [vmem:[#allocation5 + $0x128] sm:$0xf0]  ;;  %v1321_v32 = vld [vmem:[#allocation5 + $0x118] sm:$0xf0] }
  0x52   :  { %775 = vmatpush.bf16.msrb.mxu0 %v1448_v62  ;;  %v1420_v62 = vor.u32 %v1729_v50, %v1417_v52  ;;  %v1348_v3 = vor.u32 %v1711_v57, %v1345_v59  ;;  %v1739_v20 = vld [vmem:[#allocation5 + $0x224] sm:$0xf]  ;;  %v1332_v25 = vor.u32 %v1707_v18, %v1329_v19  ;;  %v1521_v28 = vld [vmem:[#allocation5 + $0x2a8] sm:$0xf0]  ;;  %v1737_v33 = vld [vmem:[#allocation5 + $0x214] sm:$0xf] }
  0x53   :  { %826 = vmatpush.bf16.msra.mxu2 %v1268_v58  ;;  %v1484_v58 = vor.u32 %v1745_v46, %v1481_v47  ;;  %v1723_v24 = vld [vmem:[#allocation5 + $0x1a4] sm:$0xf]  ;;  %v1385_v40 = vld [vmem:[#allocation5 + $0x198] sm:$0xf0]  ;;  %v1753_v41 = vld [vmem:[#allocation5 + $0x294] sm:$0xf] }
  0x54   :  { %814 = vmatpush.bf16.msrb.mxu3 %v1196_v63  ;;  %v1548_v63 = vor.u32 %v1761_v54, %v1545_v55  ;;  %v1755_v27 = vld [vmem:[#allocation5 + $0x2a4] sm:$0xf]  ;;  %v1313_v46 = vld [vmem:[#allocation5 + $0x108] sm:$0xf0]  ;;  %v1774_v4 = vld [vmem:[#allocation8 + $0x28] sm:$0xff] }
  0x55   :  { %788 = vmatpush.bf16.msrb.mxu1 %v1512_v8  ;;  %v1709_v8 = vld [vmem:[#allocation5 + $0x134] sm:$0xf]  ;;  %v1524_v36 = vor.u32 %v1755_v27, %v1521_v28  ;;  %v1703_v45 = vld [vmem:[#allocation5 + $0x104] sm:$0xf]  ;;  %v1377_v54 = vld [vmem:[#allocation5 + $0x188] sm:$0xf0] }
  0x56   :  { %776 = vmatpush.bf16.msrb.mxu0 %v1440_v16  ;;  %v1340_v13 = vor.u32 %v1709_v8, %v1337_v9  ;;  %v1529_v16 = vld [vmem:[#allocation5 + $0x2b8] sm:$0xf0]  ;;  %v1735_v47 = vld [vmem:[#allocation5 + $0x204] sm:$0xf]  ;;  %v1316_v52 = vor.u32 %v1703_v45, %v1313_v46  ;;  %v1569_v60 = vld [vmem:[#allocation5 + $0x308] sm:$0xf0] }
  0x57   :  { %827 = vmatpush.bf16.msra.mxu2 %v1260_v12  ;;  %v1725_v12 = vld [vmem:[#allocation5 + $0x1b4] sm:$0xf]  ;;  %v1532_v23 = vor.u32 %v1757_v15, %v1529_v16  ;;  %v1751_v57 = vld [vmem:[#allocation5 + $0x284] sm:$0xf]  ;;  %v1776_v2 = vld [vmem:[#allocation8 + $0x38] sm:$0xff] }
  0x58   :  { %815 = vmatpush.bf16.msrb.mxu3 %v1188_v17  ;;  %v1767_v59 = vld [vmem:[#allocation5 + $0x304] sm:$0xf] }
  0x59   :  { %789 = vmatpush.bf16.msrb.mxu1 %v1504_v26  ;;  %777 = vmatmul.bf16.vlgmr.msrb.gmra.mxu0 %v2048_v30  ;;  %v1393_v26 = vld [vmem:[#allocation5 + $0x1a8] sm:$0xf0] }
  0x5a   :  { %834 = vmatpush.bf16.msra.mxu0 %v1372_v21  ;;  %v1457_v21 = vld [vmem:[#allocation5 + $0x228] sm:$0xf0] }
  0x5b   :  { %828 = vmatpush.bf16.msra.mxu2 %v1252_v31  ;;  %816 = vmatmul.bf16.vlgmr.msrb.gmra.mxu3 %v2034_v56  ;;  %v1540_v56 = vor.u32 %v1759_v5, %v1537_v6  ;;  %v1460_v29 = vor.u32 %v1739_v20, %v1457_v21  ;;  %v1705_v31 = vld [vmem:[#allocation5 + $0x114] sm:$0xf]  ;;  %v1770_v6 = vld [vmem:[#allocation8 + $0x8] sm:$0xff] }
  0x5c   :  { %860 = vmatpush.bf16.msra.mxu3 %v1500_v22  ;;  %790 = vmatmul.bf16.vlgmr.msrb.gmra.mxu1 %v2050_v37  ;;  %v1404_v22 = vor.u32 %v1725_v12, %v1401_v14  ;;  %v1324_v39 = vor.u32 %v1705_v31, %v1321_v32  ;;  %v1773_v5 = vld [vmem:[#allocation8 + $0x20] sm:$0xff] }
  0x5d   :  { %847 = vmatpush.bf16.msra.mxu1 %v1436_v34  ;;  %v1449_v34 = vld [vmem:[#allocation5 + $0x218] sm:$0xf0] }
  0x5e   :  { %835 = vmatpush.bf16.msra.mxu0 %v1364_v38  ;;  %829 = vmatmul.bf16.vlgmr.msra.gmra.mxu2 %v2038_v1  ;;  %v1741_v1 = vld [vmem:[#allocation5 + $0x234] sm:$0xf]  ;;  %v1452_v44 = vor.u32 %v1737_v33, %v1449_v34 }
  0x5f   :  { %873 = vmatpush.bf16.msrb.mxu2 %v1564_v35  ;;  %v1468_v17 = vor.u32 %v1741_v1, %v1465_v10  ;;  %v1396_v35 = vor.u32 %v1723_v24, %v1393_v26  ;;  %v1721_v38 = vld [vmem:[#allocation5 + $0x194] sm:$0xf]  ;;  %v1782_v26 = vld [vmem:[#allocation8 + $0x68] sm:$0xff] }
  0x60   :  { %861 = vmatpush.bf16.msra.mxu3 %v1492_v42  ;;  %v1513_v42 = vld [vmem:[#allocation5 + $0x298] sm:$0xf0] }
  0x61   :  { %848 = vmatpush.bf16.msra.mxu1 %v1428_v48  ;;  %v1441_v48 = vld [vmem:[#allocation5 + $0x208] sm:$0xf0]  ;;  %v1516_v50 = vor.u32 %v1753_v41, %v1513_v42  ;;  %v1777_v41 = vld [vmem:[#allocation8 + $0x40] sm:$0xff] }
  0x62   :  { %836 = vmatpush.bf16.msra.mxu0 %v1356_v53  ;;  %v1719_v53 = vld [vmem:[#allocation5 + $0x184] sm:$0xf]  ;;  %v1444_v55 = vor.u32 %v1735_v47, %v1441_v48 }
  0x63   :  { %874 = vmatpush.bf16.msrb.mxu2 %v1556_v49  ;;  %v1388_v49 = vor.u32 %v1721_v38, %v1385_v40  ;;  %v1380_v61 = vor.u32 %v1719_v53, %v1377_v54  ;;  %v1778_v40 = vld [vmem:[#allocation8 + $0x48] sm:$0xff] }
  0x64   :  { %862 = vmatpush.bf16.msra.mxu3 %v1484_v58  ;;  %v1505_v58 = vld [vmem:[#allocation5 + $0x288] sm:$0xf0] }
  0x65   :  { %849 = vmatpush.bf16.msra.mxu1 %v1420_v62  ;;  %v1508_v62 = vor.u32 %v1751_v57, %v1505_v58 }
  0x66   :  { %837 = vmatpush.bf16.msra.mxu0 %v1348_v3  ;;  %v1775_v3 = vld [vmem:[#allocation8 + $0x30] sm:$0xff] }
  0x67   :  { %875 = vmatpush.bf16.msrb.mxu2 %v1548_v63  ;;  %v1572_v63 = vor.u32 %v1767_v59, %v1569_v60 }
  0x68   :  { %863 = vmatpush.bf16.msra.mxu3 %v1476_v7 }
  0x69   :  { %850 = vmatpush.bf16.msra.mxu1 %v1412_v11 }
  0x6a   :  { %838 = vmatpush.bf16.msra.mxu0 %v1340_v13 }
  0x6b   :  { %876 = vmatpush.bf16.msrb.mxu2 %v1540_v56 }
  0x6c   :  { %864 = vmatpush.bf16.msra.mxu3 %v1468_v17  ;;  %v1784_v17 = vld [vmem:[#allocation8 + $0x78] sm:$0xff] }
  0x6d   :  { %851 = vmatpush.bf16.msra.mxu1 %v1404_v22  ;;  %v1783_v22 = vld [vmem:[#allocation8 + $0x70] sm:$0xff] }
  0x6e   :  { %839 = vmatpush.bf16.msra.mxu0 %v1332_v25 }
  0x6f   :  { %877 = vmatpush.bf16.msrb.mxu2 %v1532_v23 }
  0x70   :  { %865 = vmatpush.bf16.msra.mxu3 %v1460_v29  ;;  %v1781_v29 = vld [vmem:[#allocation8 + $0x60] sm:$0xff] }
  0x71   :  { %852 = vmatpush.bf16.msra.mxu1 %v1396_v35  ;;  %v1780_v35 = vld [vmem:[#allocation8 + $0x58] sm:$0xff] }
  0x72   :  { %840 = vmatpush.bf16.msra.mxu0 %v1324_v39 }
  0x73   :  { %878 = vmatpush.bf16.msrb.mxu2 %v1524_v36  ;;  %v1779_v36 = vld [vmem:[#allocation8 + $0x50] sm:$0xff] }
  0x74   :  { %866 = vmatpush.bf16.msra.mxu3 %v1452_v44 }
  0x75   :  { %853 = vmatpush.bf16.msra.mxu1 %v1388_v49 }
  0x76   :  { %841 = vmatpush.bf16.msra.mxu0 %v1316_v52 }
  0x77   :  { %879 = vmatpush.bf16.msrb.mxu2 %v1516_v50 }
  0x78   :  { %867 = vmatpush.bf16.msra.mxu3 %v1444_v55 }
  0x79   :  { %854 = vmatpush.bf16.msra.mxu1 %v1380_v61  ;;  %842 = vmatmul.bf16.vlgmr.msra.gmra.mxu0 %v2032_v51  ;;  %v1772_v51 = vld [vmem:[#allocation8 + $0x18] sm:$0xff] }
  0x7b   :  { %868 = vmatmul.bf16.vlgmr.msra.gmra.mxu3 %v2048_v30  ;;  %880 = vmatpush.bf16.msrb.mxu2 %v1508_v62  ;;  %v1771_v30 = vld [vmem:[#allocation8 + $0x10] sm:$0xff] }
  0x7c   :  { %855 = vmatmul.bf16.vlgmr.msra.gmra.mxu1 %v2036_v0  ;;  %1048 = vmatpush.bf16.msrb.mxu3 %v1784_v17 }
  0x7d   :  { %1035 = vmatpush.bf16.msrb.mxu1 %v1776_v2 }
  0x7e   :  { %881 = vmatmul.bf16.vlgmr.msrb.gmra.mxu2 %v2050_v37  ;;  %v1769_v37 = vld [vmem:[#allocation8] sm:$0xff] }
  0x7f   :  { %893 = vmatpush.bf16.msra.mxu2 %v1572_v63 }
  0x80   :  { %1049 = vmatpush.bf16.msrb.mxu3 %v1783_v22 }
  0x81   :  { %1036 = vmatpush.bf16.msrb.mxu1 %v1775_v3  ;;  %v1792_v3 = vld [vmem:[#allocation10 + $0x38] sm:$0xff] }
  0x82   :  { %1131 = vmatpush.bf16.msrb.mxu0 %v1792_v3 }
  0x84   :  { %1050 = vmatpush.bf16.msrb.mxu3 %v1782_v26 }
  0x85   :  { %1037 = vmatpush.bf16.msrb.mxu1 %v1774_v4  ;;  %v1791_v4 = vld [vmem:[#allocation10 + $0x30] sm:$0xff] }
  0x86   :  { %1132 = vmatpush.bf16.msrb.mxu0 %v1791_v4 }
  0x88   :  { %1051 = vmatpush.bf16.msrb.mxu3 %v1781_v29 }
  0x89   :  { %1038 = vmatpush.bf16.msrb.mxu1 %v1773_v5  ;;  %v1790_v5 = vld [vmem:[#allocation10 + $0x28] sm:$0xff] }
  0x8a   :  { %1133 = vmatpush.bf16.msrb.mxu0 %v1790_v5 }
  0x8c   :  { %1052 = vmatpush.bf16.msrb.mxu3 %v1780_v35 }
  0x8d   :  { %1039 = vmatpush.bf16.msrb.mxu1 %v1772_v51  ;;  %v1789_v51 = vld [vmem:[#allocation10 + $0x20] sm:$0xff] }
  0x8e   :  { %1574 = vmatmul.msk.bf16.vlgmr.msra.gmra.mxu2 %vm713_vm0, %v2044_v43  ;;  %v217_v43 = vld [vmem:[#allocation7] sm:$0x3]  ;;  %1134 = vmatpush.bf16.msrb.mxu0 %v1789_v51 }
  0x8f   :  { %v219_v11 = vperm.slane %v217_v43, 0  ;;  %v220_v45 = vperm.slane %v217_v43, 1  ;;  %v1803_v43 = vld [vmem:[%s2078_s4] ss:$0 sm:$0xff]  ;;  %s1971_s4 = smov [#allocation11]  }
  0x90   :  { %1053 = vmatpush.bf16.msrb.mxu3 %v1779_v36 }
  0x91   :  { %1040 = vmatpush.bf16.msrb.mxu1 %v1771_v30  ;;  %v1788_v30 = vld [vmem:[#allocation10 + $0x18] sm:$0xff] }
  0x92   :  { %1135 = vmatpush.bf16.msrb.mxu0 %v1788_v30 }
  0x94   :  { %1054 = vmatpush.bf16.msrb.mxu3 %v1778_v40 }
  0x95   :  { %1041 = vmatpush.bf16.msrb.mxu1 %v1770_v6  ;;  %v1787_v6 = vld [vmem:[#allocation10 + $0x10] sm:$0xff] }
  0x96   :  { %1136 = vmatpush.bf16.msrb.mxu0 %v1787_v6 }
  0x98   :  { %1055 = vmatpush.bf16.msrb.mxu3 %v1777_v41 }
  0x99   :  { %1042 = vmatpush.bf16.msrb.mxu1 %v1769_v37  ;;  %v1786_v37 = vld [vmem:[#allocation10 + $0x8] sm:$0xff] }
  0x9a   :  { %1137 = vmatpush.bf16.msrb.mxu0 %v1786_v37 }
  0xb6   :  { %v726_v7 = vpop.f32.mrf.mxu0 }
  0xb7   :  { %v727_v12 = vadd.f32 %v726_v7, %v219_v11 }
  0xb9   :  { %v739_v0 = vpop.f32.mrf.mxu1 }
  0xba   :  { %v740_v14 = vadd.f32 %v739_v0, %v727_v12 }
  0xbd   :  { %v752_v8 = vpop.f32.mrf.mxu2 }
  0xbe   :  { %v765_v9 = vpop.f32.mrf.mxu3  ;;  %v728_v1 = vpop.f32.mrf.mxu0  ;;  %v753_v16 = vadd.f32 %v752_v8, %v740_v14  ;;  %v1785_v8 = vld [vmem:[#allocation10] sm:$0xff] }
  0xbf   :  { %1138 = vmatpush.bf16.msrb.mxu0 %v1785_v8 }
  0xc0   :  { %v766_v18 = vadd.f32 %v765_v9, %v753_v16  ;;  %v1805_v16 = vld [vmem:[%s2081_s7] ss:$0 sm:$0xff]  ;;  %s1169_s7 = sshll.u32 %s2082_s8, 4  ;;  %s1170_s7 = int_to_ptr.hbm [resolvable:$true] %s1169_s7 }
  0xc1   :  { %v741_v10 = vpop.f32.mrf.mxu1 }
  0xc5   :  { %v754_v56 = vpop.f32.mrf.mxu2 }
  0xc6   :  { %v767_v13 = vpop.f32.mrf.mxu3 }
  0xc7   :  { %v1804_v13 = vld [vmem:[%s2080_s6] ss:$0 sm:$0xff]  ;;  %s1167_s6 = sshll.u32 %s1971_s4, 4  ;;  %s1168_s6 = int_to_ptr.vmem [resolvable:$true] %s1167_s6 }
  0xcd   :  { %v804_v15 = vpop.f32.mrf.mxu2 }
  0xd5   :  { %v806_v21 = vpop.f32.mrf.mxu2 }
  0xd6   :  { %v778_v19 = vpop.f32.mrf.mxu0 }
  0xd7   :  { %v779_v20 = vadd.f32 %v778_v19, %v766_v18 }
  0xd9   :  { %v791_v23 = vpop.f32.mrf.mxu1 }
  0xda   :  { %v792_v24 = vadd.f32 %v791_v23, %v779_v20 }
  0xdc   :  { %v805_v25 = vadd.f32 %v804_v15, %v792_v24 }
  0xde   :  { %v899_v27 = vmax.f32 %v805_v25, 0.0  ;;  %v780_v28 = vpop.f32.mrf.mxu0  ;;  %v817_v33 = vpop.f32.mrf.mxu3 }
  0xdf   :  { %v818_v48 = vadd.f32 %v817_v33, %v220_v45 }
  0xe0   :  { %v901_v31 = vpack.c.bf16 %v899_v27, %v899_v27 }
  0xe1   :  { %v830_v32 = vpop.f32.mrf.mxu2  ;;  %v793_v34 = vpop.f32.mrf.mxu1 }
  0xe2   :  { %1043 = vmatmul.bf16.vlgmr.msrb.gmra.mxu1 %v901_v31  ;;  %v831_v52 = vadd.f32 %v830_v32, %v818_v48 }
  0xe6   :  { %v819_v39 = vpop.f32.mrf.mxu3 }
  0xe9   :  { %v832_v38 = vpop.f32.mrf.mxu2 }
  0xf6   :  { %v843_v42 = vpop.f32.mrf.mxu0 }
  0xf7   :  { %v844_v53 = vadd.f32 %v843_v42, %v831_v52 }
  0xf9   :  { %v856_v44 = vpop.f32.mrf.mxu1 }
  0xfa   :  { %v857_v57 = vadd.f32 %v856_v44, %v844_v53 }
  0xfe   :  { %v869_v46 = vpop.f32.mrf.mxu3  ;;  %v845_v47 = vpop.f32.mrf.mxu0 }
  0xff   :  { %v870_v58 = vadd.f32 %v869_v46, %v857_v57 }
 0x101   :  { %v882_v49 = vpop.f32.mrf.mxu2  ;;  %v858_v50 = vpop.f32.mrf.mxu1 }
 0x102   :  { %v883_v59 = vadd.f32 %v882_v49, %v870_v58 }
 0x106   :  { %v871_v54 = vpop.f32.mrf.mxu3 }
 0x109   :  { %v884_v55 = vpop.f32.mrf.mxu2 }
 0x111   :  { %v895_v60 = vpop.f32.mrf.mxu2 }
 0x112   :  { %v896_v61 = vadd.f32 %v895_v60, %v883_v59 }
 0x114   :  { %v900_v62 = vmax.f32 %v896_v61, 0.0 }
 0x116   :  { %v902_v63 = vpack.c.bf16 %v900_v62, %v900_v62 }
 0x118   :  { %1056 = vmatmul.bf16.vlgmr.msrb.gmra.mxu3 %v902_v63 }
 0x119   :  { %v897_v2 = vpop.f32.mrf.mxu2 }
 0x15f   :  { %v1044_v7 = vpop.f32.mrf.mxu1 }
 0x160   :  { %v1045_v9 = vadd.f32 %v1803_v43, %v1044_v7 }
 0x167   :  { %v1046_v0 = vpop.f32.mrf.mxu1 }
 0x19b   :  { %v1057_v1 = vpop.f32.mrf.mxu3 }
 0x19c   :  { %v1058_v10 = vadd.f32 %v1057_v1, %v1045_v9 }
 0x19e   :  { %v1061_v11 = vmax.f32 %v1058_v10, 0.0 }
 0x1a0   :  { %v1062_v56 = vpack.c.bf16 %v1061_v11, %v1061_v11 }
 0x1a2   :  { %1139 = vmatmul.bf16.vlgmr.msrb.gmra.mxu0 %v1062_v56 }
 0x1a3   :  { %v1059_v12 = vpop.f32.mrf.mxu3 }
 0x21f   :  { %v1140_v14 = vpop.f32.mrf.mxu0 }
 0x220   :  { %v1141_v15 = vadd.f32 %v1804_v13, %v1140_v14 }
 0x222   :  { %v1144_v17 = vmax.f32 %v1141_v15, 0.0 }
 0x224   :  { %v1149_v18 = vadd.f32 %v1805_v16, %v1144_v17 }
 0x226   :  { %1150 = vmax.xlane.f32.xlu0 %v1149_v18 }
 0x227   :  { %v1142_v19 = vpop.f32.mrf.mxu0 }
 0x299   :  { %v1151_v20 = vpop.xlane.xlu0 %1150 }
 0x29a   :  { %v1152_v21 = vsub.f32 %v1149_v18, %v1151_v20 }
 0x29c   :  { %v1153_v22 = vmul.f32 1.442695, %v1152_v21 }
 0x29e   :  { %1806 = vpow2.f32 %v1153_v22 }
 0x2a4   :  { %v1807_v23 = vpop.eup %1806 }
 0x2a5   :  { %1155 = vadd.xlane.f32.xlu0 %v1807_v23 }
 0x318   :  { %v1156_v24 = vpop.xlane.xlu0 %1155 }
 0x319   :  { %1808 = vlog2.f32 %v1156_v24 }
 0x31f   :  { %v1809_v25 = vpop.eup %1808 }
 0x320   :  { %v1158_v26 = vmul.f32 0.6931472, %v1809_v25 }
 0x322   :  { %v1159_v27 = vsub.f32 %v1152_v21, %v1158_v26 }
 0x324   :  { %v1160_v28 = vpack.c.bf16 %v1159_v27, %v1159_v27 }
 0x326   :  { %1161 = vst [vmem:[#allocation11] sm:$0xf] %v1160_v28 }
 0x327   :  { %1172 = dma.vmem_to_hbm [thread:$0]  %s1168_s6, 64, %s1170_s7, [#allocation4]  }
 0x328   :  { %1960 = dma.done.wait [#allocation4], 64  }
 0x329   :  { %1961 = vsyncadd [#allocation4], 4294967232 }
 0x32a   :  { %1177 = vsyncpa [#allocation3], 1 }
 0x32b   :  { %1178 = vsyncpa [#allocation6], 1 }
 0x32c   :  { %1179 = vsyncpa [#allocation9], 1 }
 0x32d   :  { %1180 = vsyncpa [#allocation4], 1 }

</bundles_post_ra>
